<compile_context>
chip_gen: v7x
topology: tpu7x:2x2x1
jax: 0.10.0
libtpu: 0.0.40
codegen_flags: <defaults>
</compile_context>

<pallas_src>
import jax
import jax.numpy as jnp
from jax.experimental import pallas as pl
from jax.experimental.pallas import tpu as pltpu

INPUT_SIZE = 131
HIDDEN_SIZE = 128
OUTPUT_SIZE = 41

K_PAD = 256       # padded input-feature (K) dim: multiple of 128
OUT_PAD = 128     # padded output lane width: full lane-dense stores
NEG_BIG = -1e30   # finite "-inf" for softmax padding lanes


def diagnose_kernel(x_ref, w1_ref, w2_ref, b2_ref, w3_ref, b3_ref, o_ref):
    # x block: (TB, 256) bf16.  Column 131 is a constant 1.0, and row 131 of w1
    # holds the fc1 bias, so the first matmul includes the bias for free.
    x = x_ref[...]

    # fc1 + ReLU   (Dropout(0.5) = identity in eval)
    h1 = jnp.dot(x, w1_ref[...], preferred_element_type=jnp.float32)
    h1 = jnp.maximum(h1, 0.0)

    # fc2 + ReLU   (Dropout(0.5) = identity in eval)
    h2 = jnp.dot(h1.astype(jnp.bfloat16), w2_ref[...],
                 preferred_element_type=jnp.float32) + b2_ref[...]
    h2 = jnp.maximum(h2, 0.0)

    # fc3 (output padded to 128 lanes; padding lanes get bias -1e30 -> exp ~= 0)
    logits = jnp.dot(h2.astype(jnp.bfloat16), w3_ref[...],
                     preferred_element_type=jnp.float32) + b3_ref[...]

    # softmax over the feature axis; padding lanes contribute ~0 to the sum
    m = jnp.max(logits, axis=1, keepdims=True)
    e = jnp.exp(logits - m)
    s = jnp.sum(e, axis=1, keepdims=True)
    o_ref[...] = e * pl.reciprocal(s, approx=True)


def diagnose_forward(x, params, *, training=False):
    if training:
        # TODO(synk): implement stochastic Dropout(0.5) with pltpu.prng_seed/prng_random_bits.
        raise NotImplementedError("training-mode dropout not implemented; use training=False")

    w1, b1, w2, b2, w3, b3 = params
    B = x.shape[0]

    # --- choose batch tile & pad batch ------------------------------------
    TB = min(512, max(8, ((B + 7) // 8) * 8))
    B_pad = pl.cdiv(B, TB) * TB

    # --- host-side layout prep (lane-dense, bias folding, bf16 weights) ----
    # x: (B, 131) -> (B_pad, 256) bf16, with a ones column at index INPUT_SIZE
    x_pad = jnp.zeros((B_pad, K_PAD), jnp.float32)
    x_pad = x_pad.at[:B, :INPUT_SIZE].set(x)
    x_pad = x_pad.at[:, INPUT_SIZE].set(1.0)
    x_pad = x_pad.astype(jnp.bfloat16)

    # w1: (131,128) -> (256,128), row INPUT_SIZE carries the fc1 bias
    w1_pad = jnp.zeros((K_PAD, HIDDEN_SIZE), jnp.float32)
    w1_pad = w1_pad.at[:INPUT_SIZE, :].set(w1)
    w1_pad = w1_pad.at[INPUT_SIZE, :].set(b1[0])
    w1_pad = w1_pad.astype(jnp.bfloat16)

    w2_bf = w2.astype(jnp.bfloat16)

    # w3: (128,41) -> (128,128) zero-padded; b3: (1,41) -> (1,128) with -1e30 padding
    w3_pad = jnp.zeros((HIDDEN_SIZE, OUT_PAD), jnp.float32)
    w3_pad = w3_pad.at[:, :OUTPUT_SIZE].set(w3)
    w3_pad = w3_pad.astype(jnp.bfloat16)
    b3_pad = jnp.full((1, OUT_PAD), NEG_BIG, jnp.float32)
    b3_pad = b3_pad.at[:, :OUTPUT_SIZE].set(b3)

    grid = (B_pad // TB,)

    cost = pl.CostEstimate(
        flops=2 * B_pad * (K_PAD * HIDDEN_SIZE + HIDDEN_SIZE * HIDDEN_SIZE
                           + HIDDEN_SIZE * OUT_PAD),
        transcendentals=B_pad * (OUT_PAD + 1),
        bytes_accessed=(B_pad * K_PAD * 2 + B_pad * OUT_PAD * 4
                        + (K_PAD * HIDDEN_SIZE + HIDDEN_SIZE * HIDDEN_SIZE
                           + HIDDEN_SIZE * OUT_PAD) * 2
                        + 2 * OUT_PAD * 4),
    )

    out = pl.pallas_call(
        diagnose_kernel,
        out_shape=jax.ShapeDtypeStruct((B_pad, OUT_PAD), jnp.float32),
        grid=grid,
        in_specs=[
            pl.BlockSpec((TB, K_PAD), lambda i: (i, 0)),                 # x (streamed)
            pl.BlockSpec((K_PAD, HIDDEN_SIZE), lambda i: (0, 0)),        # w1 (resident)
            pl.BlockSpec((HIDDEN_SIZE, HIDDEN_SIZE), lambda i: (0, 0)),  # w2 (resident)
            pl.BlockSpec((1, HIDDEN_SIZE), lambda i: (0, 0)),            # b2 (resident)
            pl.BlockSpec((HIDDEN_SIZE, OUT_PAD), lambda i: (0, 0)),      # w3 (resident)
            pl.BlockSpec((1, OUT_PAD), lambda i: (0, 0)),                # b3 (resident)
        ],
        out_specs=pl.BlockSpec((TB, OUT_PAD), lambda i: (i, 0)),
        compiler_params=pltpu.CompilerParams(
            dimension_semantics=("parallel",)),
        cost_estimate=cost,
    )(x_pad, w1_pad, w2_bf, b2, w3_pad, b3_pad)

    return out[:B, :OUTPUT_SIZE]


def init_params(key):
    # Deterministic init mimicking nn.Linear default (uniform +/- 1/sqrt(fan_in)).
    k1, k2, k3, k4, k5, k6 = jax.random.split(key, 6)

    def lin(kw, kb, fan_in, fan_out):
        bound = 1.0 / jnp.sqrt(fan_in)
        # stored as (in, out) so the kernel does x @ W (equivalent to PyTorch x @ W.T)
        w = jax.random.uniform(kw, (fan_in, fan_out), jnp.float32, -bound, bound)
        b = jax.random.uniform(kb, (1, fan_out), jnp.float32, -bound, bound)
        return w, b

    w1, b1 = lin(k1, k2, INPUT_SIZE, HIDDEN_SIZE)
    w2, b2 = lin(k3, k4, HIDDEN_SIZE, 128)
    w3, b3 = lin(k5, k6, 128, OUTPUT_SIZE)
    return (w1, b1, w2, b2, w3, b3)


def reference_forward(x, params):
    w1, b1, w2, b2, w3, b3 = params
    h1 = jnp.maximum(x @ w1 + b1, 0.0)
    h2 = jnp.maximum(h1 @ w2 + b2, 0.0)
    logits = h2 @ w3 + b3
    return jax.nn.softmax(logits, axis=1)


if __name__ == "__main__":
    key = jax.random.PRNGKey(0)
    kx, kp = jax.random.split(key)

    batch = 8
    x = jax.random.normal(kx, (batch, INPUT_SIZE), jnp.float32)
    params = init_params(kp)

    out = diagnose_forward(x, params)
    out = jax.block_until_ready(out)

    assert out.shape == (batch, OUTPUT_SIZE)

    # softmax rows should sum to ~1 (approx reciprocal tolerance)
    row_sums = jnp.sum(out, axis=1)
    assert bool(jnp.all(jnp.abs(row_sums - 1.0) < 5e-3)), row_sums

    # compare against the pure-JAX f32 reference (bf16 matmuls -> loose tolerance)
    ref = reference_forward(x, params)
    max_err = jnp.max(jnp.abs(out - ref))
    assert bool(max_err < 2e-2), float(max_err)

    print("KERNEL_OK")
</pallas_src>

<mosaic_0001>
module attributes {stable_mosaic.version = 11 : i64} {
  func.func @diagnose_kernel(%arg0: i32, %arg1: memref<8x256xbf16, #tpu.memory_space<vmem>>, %arg2: memref<256x128xbf16, #tpu.memory_space<vmem>>, %arg3: memref<128x128xbf16, #tpu.memory_space<vmem>>, %arg4: memref<1x128xf32, #tpu.memory_space<vmem>>, %arg5: memref<128x128xbf16, #tpu.memory_space<vmem>>, %arg6: memref<1x128xf32, #tpu.memory_space<vmem>>, %arg7: memref<8x128xf32, #tpu.memory_space<vmem>>) attributes {dimension_semantics = [#tpu.dimension_semantics<parallel>], iteration_bounds = array<i64: 1>, scalar_prefetch = 0 : i64, scratch_operands = 0 : i64, tpu.core_type = #tpu.core_type<tc>, window_params = [{transform_indices = @transform_0, window_bounds = array<i64: 8, 256>}, {pipeline_mode = #tpu.pipeline_mode<synchronous>, transform_indices = @transform_1, window_bounds = array<i64: 256, 128>}, {pipeline_mode = #tpu.pipeline_mode<synchronous>, transform_indices = @transform_2, window_bounds = array<i64: 128, 128>}, {pipeline_mode = #tpu.pipeline_mode<synchronous>, transform_indices = @transform_3, window_bounds = array<i64: 1, 128>}, {pipeline_mode = #tpu.pipeline_mode<synchronous>, transform_indices = @transform_4, window_bounds = array<i64: 128, 128>}, {pipeline_mode = #tpu.pipeline_mode<synchronous>, transform_indices = @transform_5, window_bounds = array<i64: 1, 128>}, {transform_indices = @transform_6, window_bounds = array<i64: 8, 128>}]} {
    %c0 = arith.constant 0 : index
    %c0_0 = arith.constant 0 : index
    %0 = vector.load %arg1[%c0, %c0_0] : memref<8x256xbf16, #tpu.memory_space<vmem>>, vector<8x256xbf16>
    %c0_1 = arith.constant 0 : index
    %c0_2 = arith.constant 0 : index
    %1 = vector.load %arg2[%c0_1, %c0_2] : memref<256x128xbf16, #tpu.memory_space<vmem>>, vector<256x128xbf16>
    %cst = arith.constant dense<0.000000e+00> : vector<8x128xf32>
    %2 = tpu.matmul %0, %1, %cst {dimension_numbers = #tpu.dot_dimension_numbers<[1], [0], [0], [1], [0, 0, 1, 1], [], []>} : vector<8x256xbf16>, vector<256x128xbf16>, vector<8x128xf32> -> vector<8x128xf32>
    %cst_3 = arith.constant 0.000000e+00 : f32
    %3 = vector.broadcast %cst_3 : f32 to vector<8x128xf32>
    %4 = arith.maximumf %2, %3 : vector<8x128xf32>
    %5 = arith.truncf %4 : vector<8x128xf32> to vector<8x128xbf16>
    %c0_4 = arith.constant 0 : index
    %c0_5 = arith.constant 0 : index
    %6 = vector.load %arg3[%c0_4, %c0_5] : memref<128x128xbf16, #tpu.memory_space<vmem>>, vector<128x128xbf16>
    %cst_6 = arith.constant dense<0.000000e+00> : vector<8x128xf32>
    %7 = tpu.matmul %5, %6, %cst_6 {dimension_numbers = #tpu.dot_dimension_numbers<[1], [0], [0], [1], [0, 0, 1, 1], [], []>} : vector<8x128xbf16>, vector<128x128xbf16>, vector<8x128xf32> -> vector<8x128xf32>
    %c0_7 = arith.constant 0 : index
    %c0_8 = arith.constant 0 : index
    %8 = vector.load %arg4[%c0_7, %c0_8] : memref<1x128xf32, #tpu.memory_space<vmem>>, vector<1x128xf32>
    %9 = vector.broadcast %8 : vector<1x128xf32> to vector<8x128xf32>
    %10 = arith.addf %7, %9 : vector<8x128xf32>
    %cst_9 = arith.constant 0.000000e+00 : f32
    %11 = vector.broadcast %cst_9 : f32 to vector<8x128xf32>
    %12 = arith.maximumf %10, %11 : vector<8x128xf32>
    %13 = arith.truncf %12 : vector<8x128xf32> to vector<8x128xbf16>
    %c0_10 = arith.constant 0 : index
    %c0_11 = arith.constant 0 : index
    %14 = vector.load %arg5[%c0_10, %c0_11] : memref<128x128xbf16, #tpu.memory_space<vmem>>, vector<128x128xbf16>
    %cst_12 = arith.constant dense<0.000000e+00> : vector<8x128xf32>
    %15 = tpu.matmul %13, %14, %cst_12 {dimension_numbers = #tpu.dot_dimension_numbers<[1], [0], [0], [1], [0, 0, 1, 1], [], []>} : vector<8x128xbf16>, vector<128x128xbf16>, vector<8x128xf32> -> vector<8x128xf32>
    %c0_13 = arith.constant 0 : index
    %c0_14 = arith.constant 0 : index
    %16 = vector.load %arg6[%c0_13, %c0_14] : memref<1x128xf32, #tpu.memory_space<vmem>>, vector<1x128xf32>
    %17 = vector.broadcast %16 : vector<1x128xf32> to vector<8x128xf32>
    %18 = arith.addf %15, %17 : vector<8x128xf32>
    %cst_15 = arith.constant dense<0xFF800000> : vector<8xf32>
    %19 = vector.multi_reduction <maximumf>, %18, %cst_15 [1] : vector<8x128xf32> to vector<8xf32>
    %20 = vector.shape_cast %19 : vector<8xf32> to vector<8x1xf32>
    %21 = vector.broadcast %20 : vector<8x1xf32> to vector<8x128xf32>
    %22 = arith.subf %18, %21 : vector<8x128xf32>
    %23 = math.exp %22 : vector<8x128xf32>
    %cst_16 = arith.constant dense<0.000000e+00> : vector<8xf32>
    %24 = vector.multi_reduction <add>, %23, %cst_16 [1] : vector<8x128xf32> to vector<8xf32>
    %25 = vector.shape_cast %24 : vector<8xf32> to vector<8x1xf32>
    %26 = tpu.reciprocal %25 {approx = true} : vector<8x1xf32> -> vector<8x1xf32>
    %27 = vector.broadcast %26 : vector<8x1xf32> to vector<8x128xf32>
    %28 = arith.mulf %23, %27 : vector<8x128xf32>
    %c0_17 = arith.constant 0 : index
    %c0_18 = arith.constant 0 : index
    %29 = vector.load %arg7[%c0_17, %c0_18] : memref<8x128xf32, #tpu.memory_space<vmem>>, vector<8x128xf32>
    tpu.vector_store %arg7[%c0_17, %c0_18], %28 {strides = array<i32>} : memref<8x128xf32, #tpu.memory_space<vmem>>, vector<8x128xf32>,
    return
  }
  func.func @transform_0(%arg0: i32) -> (i32, i32) {
    %c0_i32 = arith.constant 0 : i32
    %c0_i32_0 = arith.constant 0 : i32
    return %arg0, %c0_i32 : i32, i32
  }
  func.func @transform_1(%arg0: i32) -> (i32, i32) {
    %c0_i32 = arith.constant 0 : i32
    %c0_i32_0 = arith.constant 0 : i32
    %c0_i32_1 = arith.constant 0 : i32
    return %c0_i32, %c0_i32_0 : i32, i32
  }
  func.func @transform_2(%arg0: i32) -> (i32, i32) {
    %c0_i32 = arith.constant 0 : i32
    %c0_i32_0 = arith.constant 0 : i32
    %c0_i32_1 = arith.constant 0 : i32
    return %c0_i32, %c0_i32_0 : i32, i32
  }
  func.func @transform_3(%arg0: i32) -> (i32, i32) {
    %c0_i32 = arith.constant 0 : i32
    %c0_i32_0 = arith.constant 0 : i32
    %c0_i32_1 = arith.constant 0 : i32
    return %c0_i32, %c0_i32_0 : i32, i32
  }
  func.func @transform_4(%arg0: i32) -> (i32, i32) {
    %c0_i32 = arith.constant 0 : i32
    %c0_i32_0 = arith.constant 0 : i32
    %c0_i32_1 = arith.constant 0 : i32
    return %c0_i32, %c0_i32_0 : i32, i32
  }
  func.func @transform_5(%arg0: i32) -> (i32, i32) {
    %c0_i32 = arith.constant 0 : i32
    %c0_i32_0 = arith.constant 0 : i32
    %c0_i32_1 = arith.constant 0 : i32
    return %c0_i32, %c0_i32_0 : i32, i32
  }
  func.func @transform_6(%arg0: i32) -> (i32, i32) {
    %c0_i32 = arith.constant 0 : i32
    %c0_i32_0 = arith.constant 0 : i32
    return %arg0, %c0_i32 : i32, i32
  }
}

</mosaic_0001>

<bundles_post_ra>
// kernel: tpu_custom_call.1
= control target key start
LH: loop header
LB: loop body
LE: loop exit
PB: predicated region body
PF: predicated region fallthrough
CT: control target
= control target key end

     0   :  { %11 = vsyncpa [#allocation3], 0  ;;  %s925_s0 = inlined_call_operand.hbm [shape: bf16[8,256], index: 0, kind: input, shape index: {}]   ;;  %s926_s1 = inlined_call_operand.hbm [shape: bf16[256,128], index: 1, kind: input, shape index: {}]   ;;  %s927_s2 = inlined_call_operand.hbm [shape: bf16[128,128], index: 2, kind: input, shape index: {}]   ;;  %s928_s3 = inlined_call_operand.vmem [shape: f32[1,128], index: 3, kind: input, shape index: {}]   ;;  %s929_s4 = inlined_call_operand.hbm [shape: bf16[128,128], index: 4, kind: input, shape index: {}]   ;;  %s930_s5 = inlined_call_operand.vmem [shape: f32[1,128], index: 5, kind: input, shape index: {}]   ;;  %s931_s6 = inlined_call_operand.hbm [shape: f32[8,128], index: 6, kind: output, shape index: {}]  }
   0x1   :  { %12 = vsyncpa [#allocation6], 0 }
   0x2   :  { %13 = vsyncpa [#allocation9], 0 }
   0x3   :  { %14 = vsyncpa [#allocation4], 0  ;;  %s788_s21 = smov [#allocation5]   ;;  %s670_s25 = scalar_lea.hbm %s926_s1, 2048 }
   0x4   :  { %s30_s22 = sshll.u32 %s788_s21, 4  ;;  %p671_p0 = scmp.ne.s32.totalorder %s926_s1, %s670_s25  ;;  %s31_s22 = int_to_ptr.vmem [resolvable:$true] %s30_s22 }
   0x5   :  { %p674_p1 = scmp.lt.u32.totalorder %s670_s25, %s926_s1 }
   0x7   :  { %p676_p2 = pnand %p674_p1, %p671_p0 }
   0x9   :  { %679 = shalt.err (!%p676_p2)
}
   0xa   :  { %s680_s30 = scalar_lea.vmem %s31_s22, 2048  ;;  %p685_p4 = scmp.lt.s32.totalorder %s31_s22, %s31_s22 }
   0xb   :  { %p681_p3 = scmp.ne.s32.totalorder %s31_s22, %s680_s30  ;;  %p686_p5 = scmp.lt.s32.totalorder %s680_s30, %s680_s30 }
   0xd   :  { %p687_p6 = por %p686_p5, %p685_p4 }
   0xf   :  { %p688_p7 = pnand %p687_p6, %p681_p3 }
  0x11   :  { %691 = shalt.err (!%p688_p7)
}
  0x12   :  { %s789_s7 = smov 64   ;;  %s790_s8 = smov 4  }
  0x13   :  { %36 = dma.hbm_to_vmem [thread:$0]  %s926_s1, 2048, %s31_s22, [#allocation6], %s789_s7, %s789_s7, %s790_s8  }
  0x14   :  { %s791_s11 = smov [#allocation2]   ;;  %s792_s13 = smov [#allocation7]  }
  0x15   :  { %s21_s12 = sshll.u32 %s791_s11, 4  ;;  %s42_s14 = sshll.u32 %s792_s13, 4  ;;  %s22_s12 = int_to_ptr.vmem [resolvable:$true] %s21_s12  ;;  %s43_s14 = int_to_ptr.vmem [resolvable:$true] %s42_s14 }
  0x16   :  { %s692_s17 = scalar_lea.hbm %s925_s0, 128 }
  0x17   :  { %p693_p8 = scmp.ne.s32.totalorder %s925_s0, %s692_s17  ;;  %p696_p9 = scmp.lt.u32.totalorder %s692_s17, %s925_s0 }
  0x19   :  { %p698_p10 = pnand %p696_p9, %p693_p8 }
  0x1b   :  { %701 = shalt.err (!%p698_p10)
}
  0x1c   :  { %s702_s1 = scalar_lea.vmem %s22_s12, 128  ;;  %p707_p12 = scmp.lt.s32.totalorder %s22_s12, %s22_s12 }
  0x1d   :  { %p703_p11 = scmp.ne.s32.totalorder %s22_s12, %s702_s1  ;;  %p708_p13 = scmp.lt.s32.totalorder %s702_s1, %s702_s1 }
  0x1f   :  { %p709_p0 = por %p708_p13, %p707_p12 }
  0x21   :  { %p710_p1 = pnand %p709_p0, %p703_p11 }
  0x23   :  { %713 = shalt.err (!%p710_p1)
}
  0x24   :  { %24 = dma.hbm_to_vmem [thread:$0]  %s925_s0, 128, %s22_s12, [#allocation3]  }
  0x25   :  { %s714_s26 = scalar_lea.hbm %s927_s2, 1024 }
  0x26   :  { %p715_p2 = scmp.ne.s32.totalorder %s927_s2, %s714_s26  ;;  %p718_p3 = scmp.lt.u32.totalorder %s714_s26, %s927_s2 }
  0x28   :  { %p720_p4 = pnand %p718_p3, %p715_p2 }
  0x2a   :  { %723 = shalt.err (!%p720_p4)
}
  0x2b   :  { %s724_s9 = scalar_lea.vmem %s43_s14, 1024  ;;  %p729_p6 = scmp.lt.s32.totalorder %s43_s14, %s43_s14 }
  0x2c   :  { %p725_p5 = scmp.ne.s32.totalorder %s43_s14, %s724_s9  ;;  %p730_p7 = scmp.lt.s32.totalorder %s724_s9, %s724_s9 }
  0x2e   :  { %p731_p8 = por %p730_p7, %p729_p6 }
  0x30   :  { %p732_p9 = pnand %p731_p8, %p725_p5 }
  0x32   :  { %735 = shalt.err (!%p732_p9)
}
  0x33   :  { %48 = dma.hbm_to_vmem [thread:$0]  %s927_s2, 1024, %s43_s14, [#allocation6], %s789_s7, %s789_s7, %s790_s8  }
  0x34   :  { %s793_s11 = smov [#allocation8]   ;;  %s736_s16 = scalar_lea.hbm %s929_s4, 1024 }
  0x35   :  { %s56_s12 = sshll.u32 %s793_s11, 4  ;;  %p737_p10 = scmp.ne.s32.totalorder %s929_s4, %s736_s16  ;;  %s57_s12 = int_to_ptr.vmem [resolvable:$true] %s56_s12 }
  0x36   :  { %p740_p11 = scmp.lt.u32.totalorder %s736_s16, %s929_s4 }
  0x38   :  { %p742_p12 = pnand %p740_p11, %p737_p10 }
  0x3a   :  { %745 = shalt.err (!%p742_p12)
}
  0x3b   :  { %s746_s21 = scalar_lea.vmem %s57_s12, 1024  ;;  %p751_p0 = scmp.lt.s32.totalorder %s57_s12, %s57_s12 }
  0x3c   :  { %p747_p13 = scmp.ne.s32.totalorder %s57_s12, %s746_s21  ;;  %p752_p1 = scmp.lt.s32.totalorder %s746_s21, %s746_s21 }
  0x3e   :  { %p753_p2 = por %p752_p1, %p751_p0 }
  0x40   :  { %p754_p3 = pnand %p753_p2, %p747_p13 }
  0x42   :  { %757 = shalt.err (!%p754_p3)
}
  0x43   :  { %62 = dma.hbm_to_vmem [thread:$0]  %s929_s4, 1024, %s57_s12, [#allocation9], %s789_s7, %s789_s7, %s790_s8  }
  0x44   :  { %780 = dma.done.wait [#allocation3], 128  }
  0x45   :  { %781 = vsyncadd [#allocation3], 4294967168 }
  0x46   :  { %782 = dma.done.wait [#allocation6], 3072  }
  0x47   :  { %783 = vsyncadd [#allocation6], 4294964224 }
  0x48   :  { %784 = dma.done.wait [#allocation9], 1024  }
  0x49   :  { %785 = vsyncadd [#allocation9], 4294966272  ;;  %v794_v0 = vmov 0.0   ;;  %v632_v1 = vld [vmem:[#allocation5 + $0x40] sm:$0xff]   ;;  %v634_v3 = vld [vmem:[#allocation5 + $0x48] sm:$0xff]   ;;  %vm795_vm0 = vmmov 0  }
  0x4a   :  { %583 = vmatprep.subr.bf16.mxu1 %v794_v0  ;;  %v633_v2 = vld [vmem:[#allocation5] sm:$0xff]   ;;  %543 = vmatprep.subr.bf16.mxu0 %v632_v1  ;;  %v635_v4 = vld [vmem:[#allocation5 + $0x8] sm:$0xff]   ;;  %v636_v5 = vld [vmem:[#allocation5 + $0x50] sm:$0xff]  }
  0x4b   :  { %544 = vmatpush3.bf16.msra.mxu0 %v633_v2  ;;  %v637_v6 = vld [vmem:[#allocation5 + $0x10] sm:$0xff]   ;;  %v638_v7 = vld [vmem:[#allocation5 + $0x58] sm:$0xff]   ;;  %v640_v9 = vld [vmem:[#allocation5 + $0x60] sm:$0xff]   ;;  %599 = vmatprep.mubr.msk.bf16.mxu1 %vm795_vm0, %v794_v0 }
  0x4c   :  { %545 = vmatprep.subr.bf16.mxu0 %v634_v3  ;;  %v639_v8 = vld [vmem:[#allocation5 + $0x18] sm:$0xff]   ;;  %v641_v10 = vld [vmem:[#allocation5 + $0x20] sm:$0xff]   ;;  %v642_v11 = vld [vmem:[#allocation5 + $0x68] sm:$0xff]  }
  0x4d   :  { %v78_v12 = vld [vmem:[#allocation2] sm:$0xff]  ;;  %v650_v14 = vld [vmem:[#allocation7] sm:$0xff]   ;;  %v643_v15 = vld [vmem:[#allocation5 + $0x28] sm:$0xff]  }
  0x4e   :  { %v508_v13 = vcombine.high %v78_v12, %v78_v12  ;;  %v644_v16 = vld [vmem:[#allocation5 + $0x70] sm:$0xff]   ;;  %584 = vmatpush3.bf16.msra.mxu1 %v650_v14  ;;  %v651_v17 = vld [vmem:[#allocation7 + $0x8] sm:$0xff]   ;;  %v646_v19 = vld [vmem:[#allocation5 + $0x78] sm:$0xff]   ;;  %v507_v23 = vcombine.low %v78_v12, %v78_v12 }
  0x4f   :  { %546 = vmatpush3.bf16.msra.mxu0 %v635_v4  ;;  %v645_v18 = vld [vmem:[#allocation5 + $0x30] sm:$0xff]   ;;  %585 = vmatprep.subr.bf16.mxu1 %v794_v0  ;;  %v647_v21 = vld [vmem:[#allocation5 + $0x38] sm:$0xff]   ;;  %v654_v24 = vld [vmem:[#allocation7 + $0x20] sm:$0xff]  }
  0x50   :  { %547 = vmatprep.subr.bf16.mxu0 %v636_v5  ;;  %246 = vmatprep.mubr.bf16.mxu0 %v508_v13  ;;  %v652_v20 = vld [vmem:[#allocation7 + $0x10] sm:$0xff]   ;;  %v653_v22 = vld [vmem:[#allocation7 + $0x18] sm:$0xff]   ;;  %v655_v25 = vld [vmem:[#allocation7 + $0x28] sm:$0xff]  }
  0x51   :  { %v656_v26 = vld [vmem:[#allocation7 + $0x30] sm:$0xff]   ;;  %v657_v27 = vld [vmem:[#allocation7 + $0x38] sm:$0xff]   ;;  %v658_v28 = vld [vmem:[#allocation8] sm:$0xff]  }
  0x52   :  { %586 = vmatpush3.bf16.msra.mxu1 %v651_v17  ;;  %v659_v29 = vld [vmem:[#allocation8 + $0x8] sm:$0xff]   ;;  %v660_v30 = vld [vmem:[#allocation8 + $0x10] sm:$0xff]   ;;  %v661_v31 = vld [vmem:[#allocation8 + $0x18] sm:$0xff]  }
  0x53   :  { %548 = vmatpush3.bf16.msra.mxu0 %v637_v6  ;;  %587 = vmatprep.subr.bf16.mxu1 %v794_v0  ;;  %v662_v32 = vld [vmem:[#allocation8 + $0x20] sm:$0xff]   ;;  %v663_v33 = vld [vmem:[#allocation8 + $0x28] sm:$0xff]   ;;  %v664_v41 = vld [vmem:[#allocation8 + $0x30] sm:$0xff]  }
  0x54   :  { %549 = vmatprep.subr.bf16.mxu0 %v638_v7  ;;  %v665_v42 = vld [vmem:[#allocation8 + $0x38] sm:$0xff]  }
  0x55   :  { %v525_v43 = vld [vmem:[%s928_s3] ss:$0 sm:$0xff]  ;;  %s796_s3 = smov [#allocation10]  }
  0x56   :  { %588 = vmatpush3.bf16.msra.mxu1 %v652_v20  ;;  %v534_v51 = vld [vmem:[%s930_s5] ss:$0 sm:$0xff]  ;;  %s496_s22 = sshll.u32 %s796_s3, 4  ;;  %s497_s22 = int_to_ptr.vmem [resolvable:$true] %s496_s22 }
  0x57   :  { %550 = vmatpush3.bf16.msra.mxu0 %v639_v8  ;;  %589 = vmatprep.subr.bf16.mxu1 %v794_v0  ;;  %s758_s5 = scalar_lea.vmem %s497_s22, 128  ;;  %p763_p5 = scmp.lt.s32.totalorder %s497_s22, %s497_s22 }
  0x58   :  { %551 = vmatprep.subr.bf16.mxu0 %v640_v9  ;;  %p759_p4 = scmp.ne.s32.totalorder %s497_s22, %s758_s5  ;;  %p764_p6 = scmp.lt.s32.totalorder %s758_s5, %s758_s5 }
  0x5a   :  { %590 = vmatpush3.bf16.msra.mxu1 %v653_v22  ;;  %p765_p7 = por %p764_p6, %p763_p5 }
  0x5b   :  { %552 = vmatpush3.bf16.msra.mxu0 %v641_v10  ;;  %591 = vmatprep.subr.bf16.mxu1 %v794_v0 }
  0x5c   :  { %553 = vmatprep.subr.bf16.mxu0 %v642_v11  ;;  %p766_p8 = pnand %p765_p7, %p759_p4 }
  0x5e   :  { %592 = vmatpush3.bf16.msra.mxu1 %v654_v24 }
  0x5f   :  { %554 = vmatpush3.bf16.msra.mxu0 %v643_v15  ;;  %593 = vmatprep.subr.bf16.mxu1 %v794_v0 }
  0x60   :  { %555 = vmatprep.subr.bf16.mxu0 %v644_v16 }
  0x62   :  { %594 = vmatpush3.bf16.msra.mxu1 %v655_v25 }
  0x63   :  { %556 = vmatpush3.bf16.msra.mxu0 %v645_v18  ;;  %595 = vmatprep.subr.bf16.mxu1 %v794_v0 }
  0x64   :  { %557 = vmatprep.subr.bf16.mxu0 %v646_v19 }
  0x66   :  { %596 = vmatpush3.bf16.msra.mxu1 %v656_v26 }
  0x67   :  { %558 = vmatpush3.bf16.msra.mxu0 %v647_v21  ;;  %597 = vmatprep.subr.bf16.mxu1 %v794_v0 }
  0x68   :  { %603 = vmatprep.subr.bf16.mxu0 %v794_v0 }
  0x6a   :  { %247 = vmatmul.mubr.bf16.vlgmr.msra.gmra.mrb[0].mxu0 %v507_v23  ;;  %598 = vmatpush3.bf16.msra.mxu1 %v657_v27 }
  0x6b   :  { %619 = vmatprep.mubr.msk.bf16.mxu0 %vm795_vm0, %v794_v0  ;;  %604 = vmatpush3.bf16.msra.mxu0 %v658_v28 }
  0x6c   :  { %605 = vmatprep.subr.bf16.mxu0 %v794_v0 }
  0x6f   :  { %606 = vmatpush3.bf16.msra.mxu0 %v659_v29 }
  0x70   :  { %607 = vmatprep.subr.bf16.mxu0 %v794_v0 }
  0x73   :  { %608 = vmatpush3.bf16.msra.mxu0 %v660_v30 }
  0x74   :  { %609 = vmatprep.subr.bf16.mxu0 %v794_v0 }
  0x77   :  { %610 = vmatpush3.bf16.msra.mxu0 %v661_v31 }
  0x78   :  { %611 = vmatprep.subr.bf16.mxu0 %v794_v0 }
  0x7b   :  { %612 = vmatpush3.bf16.msra.mxu0 %v662_v32 }
  0x7c   :  { %613 = vmatprep.subr.bf16.mxu0 %v794_v0 }
  0x7f   :  { %614 = vmatpush3.bf16.msra.mxu0 %v663_v33 }
  0x80   :  { %615 = vmatprep.subr.bf16.mxu0 %v794_v0 }
  0x83   :  { %616 = vmatpush3.bf16.msra.mxu0 %v664_v41 }
  0x84   :  { %617 = vmatprep.subr.bf16.mxu0 %v794_v0 }
  0x87   :  { %618 = vmatpush3.bf16.msra.mxu0 %v665_v42 }
 0x13d   :  { %v559_v34 = vpop.f32.mrb[0].mxu0 }
 0x13e   :  { %v560_v35 = vpop.f32.mrb[1].mxu0 }
 0x13f   :  { %v561_v36 = vadd.f32 %v560_v35, %v559_v34  ;;  %v562_v37 = vpop.f32.mrb[2].mxu0 }
 0x140   :  { %v563_v38 = vpop.f32.mrb[3].mxu0 }
 0x141   :  { %v254_v39 = vmax.f32 %v561_v36, 0.0 }
 0x143   :  { %v255_v40 = vpack.c.bf16 %v254_v39, %v254_v39 }
 0x145   :  { %600 = vmatmul.mubr.bf16.vlgmr.msra.gmra.mrb[0].mxu1 %v255_v40 }
 0x218   :  { %v361_v44 = vpop.f32.mrb[0].mxu1 }
 0x219   :  { %v362_v45 = vadd.f32 %v525_v43, %v361_v44  ;;  %v601_v46 = vpop.f32.mrb[1].mxu1 }
 0x21a   :  { %v364_v47 = vpop.f32.mrb[2].mxu1 }
 0x21b   :  { %v367_v48 = vmax.f32 %v362_v45, 0.0  ;;  %v602_v49 = vpop.f32.mrb[3].mxu1 }
 0x21d   :  { %v368_v50 = vpack.c.bf16 %v367_v48, %v367_v48 }
 0x21f   :  { %620 = vmatmul.mubr.bf16.vlgmr.msra.gmra.mrb[4].mxu0 %v368_v50 }
 0x2f2   :  { %v474_v52 = vpop.f32.mrb[4].mxu0 }
 0x2f3   :  { %v475_v53 = vadd.f32 %v534_v51, %v474_v52  ;;  %v621_v54 = vpop.f32.mrb[5].mxu0 }
 0x2f4   :  { %v477_v55 = vpop.f32.mrb[6].mxu0 }
 0x2f5   :  { %480 = vmax.xlane.f32.xlu0 %v475_v53  ;;  %v622_v56 = vpop.f32.mrb[7].mxu0 }
 0x382   :  { %v481_v57 = vpop.xlane.xlu0 %480 }
 0x383   :  { %v482_v58 = vsub.f32 %v475_v53, %v481_v57 }
 0x385   :  { %v483_v59 = vmul.f32 1.442695, %v482_v58 }
 0x387   :  { %666 = vpow2.f32 %v483_v59 }
 0x391   :  { %v667_v60 = vpop.eup %666 }
 0x392   :  { %485 = vadd.xlane.f32.xlu0 %v667_v60 }
 0x41f   :  { %v486_v61 = vpop.xlane.xlu0 %485 }
 0x420   :  { %668 = vrcp.f32 %v486_v61 }
 0x42a   :  { %v669_v62 = vpop.eup %668 }
 0x42b   :  { %v488_v63 = vmul.f32 %v669_v62, %v667_v60 }
 0x42d   :  { %489 = vst [vmem:[#allocation10] sm:$0xff] %v488_v63 }
 0x42e   :  { %769 = shalt.err (!%p766_p8)
}
 0x42f   :  { %s770_s25 = scalar_lea.hbm %s931_s6, 128 }
 0x430   :  { %p771_p9 = scmp.ne.s32.totalorder %s931_s6, %s770_s25  ;;  %p774_p10 = scmp.lt.u32.totalorder %s770_s25, %s931_s6 }
 0x432   :  { %p776_p11 = pnand %p774_p10, %p771_p9 }
 0x434   :  { %779 = shalt.err (!%p776_p11)
}
 0x435   :  { %499 = dma.vmem_to_hbm [thread:$0]  %s497_s22, 128, %s931_s6, [#allocation4]  }
 0x436   :  { %786 = dma.done.wait [#allocation4], 128  }
 0x437   :  { %787 = vsyncadd [#allocation4], 4294967168 }
 0x438   :  { %503 = vsyncpa [#allocation3], 1 }
 0x439   :  { %504 = vsyncpa [#allocation6], 1 }
 0x43a   :  { %505 = vsyncpa [#allocation9], 1 }
 0x43b   :  { %506 = vsyncpa [#allocation4], 1 }

</bundles_post_ra>
